<compile_context>
chip_gen: v7x
topology: tpu7x:2x2x1
jax: 0.10.0
libtpu: 0.0.40
codegen_flags: <defaults>
</compile_context>

<pallas_src>
import functools

import jax
import jax.numpy as jnp
from jax import lax
from jax.experimental import pallas as pl
from jax.experimental.pallas import tpu as pltpu

LANE = 128


def _sublane_multiple(dtype):
    """Sublane packing multiple for a dtype (8 for 4B, 16 for 2B, 32 for 1B)."""
    itemsize = jnp.dtype(dtype).itemsize
    return max(8, 32 // max(int(itemsize), 1))


def _num_tensorcores_per_device():
    """2 on multi-TensorCore parts (v7x); 1 on v5e/v6e (single TC)."""
    try:
        kind = jax.devices()[0].device_kind.lower()
    except Exception:
        return 1
    return 2 if "7" in kind else 1


def _iou_partial_kernel(sr_ref, gt_ref, out_ref, acc_ref, *,
                        block_rows, steps_per_core, rows_total,
                        needs_row_mask, full_vreg):
    """Accumulates per-core partial sums of (sigmoid(sr)*gt) and (sigmoid(sr)+gt).

    Grid = (num_parallel, steps_per_core). Axis 0 is the (optional) core split,
    axis 1 is the 'arbitrary' reduction axis. acc_ref is a (2, acc_rows, 128)
    f32 VMEM scratch (acc_rows=8 full-vreg accumulation, 1 for the tiny
    single-block fallback). out_ref is the (1, 2, acc_rows, 128) per-core
    partial block, written once at the last reduction step.
    """
    p = pl.program_id(0)
    k = pl.program_id(1)

    @pl.when(k == 0)
    def _():
        acc_ref[...] = jnp.zeros_like(acc_ref)

    x = sr_ref[...].astype(jnp.float32)
    # sigmoid(x) == 0.5 * tanh(0.5 * x) + 0.5 : a single EUP pass instead of
    # exp + reciprocal (+ Newton refinement on the VPU).
    sr = 0.5 * jnp.tanh(0.5 * x) + 0.5
    gt = gt_ref[...].astype(jnp.float32)

    if full_vreg:
        groups = block_rows // 8

        def accumulate(srv, gtv):
            # Plain VPU adds across whole vregs; no cross-sublane XLU reduce,
            # no masked sub-tile stores.  The reshape groups whole (8,128)
            # tiles, so it is layout-free.
            acc_ref[0] = acc_ref[0] + (srv * gtv).reshape(groups, 8, LANE).sum(axis=0)
            acc_ref[1] = acc_ref[1] + (srv + gtv).reshape(groups, 8, LANE).sum(axis=0)
    else:
        # Tiny single-block inputs whose row count is not a multiple of 8.
        def accumulate(srv, gtv):
            acc_ref[0] = acc_ref[0] + jnp.sum(srv * gtv, axis=0, keepdims=True)
            acc_ref[1] = acc_ref[1] + jnp.sum(srv + gtv, axis=0, keepdims=True)

    if needs_row_mask:
        # Only the ragged last real block and the clamped phantom block(s)
        # extend past rows_total; everything else takes the unmasked path.
        blk = p * steps_per_core + k
        is_edge = (blk + 1) * block_rows > rows_total

        @pl.when(is_edge)
        def _():
            rid = blk * block_rows + lax.broadcasted_iota(
                jnp.int32, (block_rows, 1), 0)
            valid = rid < rows_total
            accumulate(jnp.where(valid, sr, 0.0), jnp.where(valid, gt, 0.0))

        @pl.when(jnp.logical_not(is_edge))
        def _():
            accumulate(sr, gt)
    else:
        accumulate(sr, gt)

    @pl.when(k == pl.num_programs(1) - 1)
    def _():
        out_ref[0] = acc_ref[...]


def iou_loss(SR, GT, smooth=1.0, tile_rows=8192):
    assert SR.shape == GT.shape, (
        "Predicted and Groundtruth image must have same size!")

    n = int(SR.size)
    sr_flat = SR.reshape(-1)
    gt_flat = GT.reshape(-1)
    smooth_f = jnp.float32(smooth)

    # --- lane-misaligned tail (< 128 elements): tiny jnp reduction ----------
    n_main = (n // LANE) * LANE
    tail = n - n_main
    if tail:
        sr_t = jax.nn.sigmoid(sr_flat[n_main:].astype(jnp.float32))
        gt_t = gt_flat[n_main:].astype(jnp.float32)
        inter_tail = jnp.sum(sr_t * gt_t)
        total_tail = jnp.sum(sr_t + gt_t)
    else:
        inter_tail = jnp.float32(0.0)
        total_tail = jnp.float32(0.0)

    if n_main == 0:
        intersection = inter_tail + smooth_f
        total = total_tail
        union = total - intersection
        return jnp.float32(1.0) - intersection / (union + smooth_f)

    # --- aligned prefix: Pallas streaming reduction --------------------------
    rows_total = n_main // LANE
    sr_2d = (sr_flat[:n_main] if tail else sr_flat).reshape(rows_total, LANE)
    gt_2d = (gt_flat[:n_main] if tail else gt_flat).reshape(rows_total, LANE)

    # Dtype-aware sublane floor (8 for 32-bit, 16 for 16-bit, 32 for 8-bit).
    sub = max(_sublane_multiple(sr_2d.dtype), _sublane_multiple(gt_2d.dtype))
    tile_rows = max(sub, (int(tile_rows) // sub) * sub)
    block_rows = min(tile_rows, rows_total)

    full_vreg = (block_rows % 8 == 0)
    acc_rows = 8 if full_vreg else 1

    steps_total = pl.cdiv(rows_total, block_rows)
    # 2-way core split only on multi-TC chips (v7x); pure overhead on v5e/v6e.
    num_parallel = 2 if (_num_tensorcores_per_device() == 2
                         and steps_total >= 2) else 1
    steps_per_core = pl.cdiv(steps_total, num_parallel)
    covered_rows = num_parallel * steps_per_core * block_rows
    needs_row_mask = covered_rows != rows_total

    if num_parallel * steps_per_core == steps_total:
        def in_map(p, k):
            return (p * steps_per_core + k, 0)
    else:
        # Phantom trailing block(s) from the core split: clamp to the last real
        # block; the edge-block mask zeroes their contribution.
        last_block = steps_total - 1

        def in_map(p, k):
            return (jnp.minimum(p * steps_per_core + k, last_block), 0)

    kernel = functools.partial(
        _iou_partial_kernel,
        block_rows=block_rows,
        steps_per_core=steps_per_core,
        rows_total=rows_total,
        needs_row_mask=needs_row_mask,
        full_vreg=full_vreg,
    )

    bytes_accessed = int(sr_2d.size) * sr_2d.dtype.itemsize \
        + int(gt_2d.size) * gt_2d.dtype.itemsize \
        + num_parallel * 2 * acc_rows * LANE * 4
    cost = pl.CostEstimate(flops=4 * n_main, transcendentals=n_main,
                           bytes_accessed=bytes_accessed)

    def run(dim_sems):
        return pl.pallas_call(
            kernel,
            out_shape=jax.ShapeDtypeStruct(
                (num_parallel, 2, acc_rows, LANE), jnp.float32),
            grid_spec=pltpu.PrefetchScalarGridSpec(
                num_scalar_prefetch=0,
                grid=(num_parallel, steps_per_core),
                in_specs=[
                    pl.BlockSpec((block_rows, LANE), in_map),
                    pl.BlockSpec((block_rows, LANE), in_map),
                ],
                out_specs=pl.BlockSpec((1, 2, acc_rows, LANE),
                                       lambda p, k: (p, 0, 0, 0)),
                scratch_shapes=[pltpu.VMEM((2, acc_rows, LANE), jnp.float32)],
            ),
            compiler_params=pltpu.CompilerParams(
                dimension_semantics=dim_sems,
                # 2 inputs x 2 buffers x 4 MiB = 16 MiB at tile_rows=8192 f32;
                # raise the scoped limit above v5e's 16 MiB default.
                vmem_limit_bytes=24 << 20),
            cost_estimate=cost,
        )(sr_2d, gt_2d)

    core_parallel = getattr(pltpu, "CORE_PARALLEL", None)
    if num_parallel == 2 and core_parallel is not None:
        try:
            partials = run((core_parallel, pltpu.ARBITRARY))
        except Exception:
            # Fallback if CORE_PARALLEL is rejected by the lowering.
            partials = run((pltpu.PARALLEL, pltpu.ARBITRARY))
    else:
        partials = run((pltpu.PARALLEL, pltpu.ARBITRARY))

    inter_main = jnp.sum(partials[:, 0])
    total_main = jnp.sum(partials[:, 1])

    intersection = inter_main + inter_tail + smooth_f
    total = total_main + total_tail
    union = total - intersection
    return jnp.float32(1.0) - intersection / (union + smooth_f)


def iou_loss_ref(SR, GT, smooth=1.0):
    sr = jax.nn.sigmoid(SR.astype(jnp.float32)).reshape(-1)
    gt = GT.astype(jnp.float32).reshape(-1)
    intersection = jnp.sum(sr * gt) + smooth
    total = jnp.sum(sr + gt)
    union = total - intersection
    return 1.0 - intersection / (union + smooth)


if __name__ == "__main__":
    # Primary case: NCHW logits + binary mask, matching the PyTorch module.
    k_sr, k_gt = jax.random.split(jax.random.PRNGKey(0))
    shape = (2, 4, 16, 16)
    SR = jax.random.normal(k_sr, shape, dtype=jnp.float32)            # logits
    GT = (jax.random.uniform(k_gt, shape) > 0.5).astype(jnp.float32)  # mask

    loss = jax.block_until_ready(iou_loss(SR, GT, smooth=1.0))
    ref = iou_loss_ref(SR, GT, smooth=1.0)
    assert jnp.allclose(loss, ref, rtol=1e-5, atol=1e-5), (loss, ref)

    # Multi-step reduction with a ragged last block (small tile_rows forces
    # several grid steps; only the edge block takes the masked path).
    k1, k2 = jax.random.split(jax.random.PRNGKey(1))
    shape2 = (2, 4, 16, 18)   # 2304 elements -> 18 rows of 128
    SR2 = jax.random.normal(k1, shape2, dtype=jnp.float32)
    GT2 = (jax.random.uniform(k2, shape2) > 0.5).astype(jnp.float32)
    loss2 = jax.block_until_ready(iou_loss(SR2, GT2, smooth=1.0, tile_rows=8))
    ref2 = iou_loss_ref(SR2, GT2, smooth=1.0)
    assert jnp.allclose(loss2, ref2, rtol=1e-5, atol=1e-5), (loss2, ref2)

    # Element count not a multiple of 128: aligned prefix goes through the
    # kernel (single 58-row block -> fallback accumulator), tail via jnp.
    k3, k4 = jax.random.split(jax.random.PRNGKey(2))
    shape3 = (1, 3, 50, 50)   # 7500 elements = 58*128 + 76
    SR3 = jax.random.normal(k3, shape3, dtype=jnp.float32)
    GT3 = (jax.random.uniform(k4, shape3) > 0.5).astype(jnp.float32)
    loss3 = jax.block_until_ready(iou_loss(SR3, GT3, smooth=1.0))
    ref3 = iou_loss_ref(SR3, GT3, smooth=1.0)
    assert jnp.allclose(loss3, ref3, rtol=1e-5, atol=1e-5), (loss3, ref3)

    # Narrow native dtypes (bf16 logits, uint8 mask), multi-block, dtype-aware
    # sublane floor (32 rows for the uint8 operand).
    k5, k6 = jax.random.split(jax.random.PRNGKey(3))
    shape4 = (2, 4, 32, 32)   # 8192 elements -> 64 rows of 128
    SR4 = jax.random.normal(k5, shape4, dtype=jnp.bfloat16)
    GT4 = (jax.random.uniform(k6, shape4) > 0.5).astype(jnp.uint8)
    loss4 = jax.block_until_ready(iou_loss(SR4, GT4, smooth=1.0, tile_rows=32))
    ref4 = iou_loss_ref(SR4, GT4, smooth=1.0)
    assert jnp.allclose(loss4, ref4, rtol=1e-5, atol=1e-5), (loss4, ref4)

    print("KERNEL_OK")
</pallas_src>

<mosaic_0001>
module attributes {stable_mosaic.version = 11 : i64} {
  func.func @_iou_partial_kernel(%arg0: i32, %arg1: i32, %arg2: memref<16x128xf32, #tpu.memory_space<vmem>>, %arg3: memref<16x128xf32, #tpu.memory_space<vmem>>, %arg4: memref<1x2x8x128xf32, #tpu.memory_space<vmem>>, %arg5: memref<2x8x128xf32, #tpu.memory_space<vmem>>) attributes {dimension_semantics = [#tpu.dimension_semantics<parallel>, #tpu.dimension_semantics<arbitrary>], iteration_bounds = array<i64: 1, 1>, scalar_prefetch = 0 : i64, scratch_operands = 1 : i64, tpu.core_type = #tpu.core_type<tc>, window_params = [{transform_indices = @transform_0, window_bounds = array<i64: 16, 128>}, {transform_indices = @transform_1, window_bounds = array<i64: 16, 128>}, {transform_indices = @transform_2, window_bounds = array<i64: 1, 2, 8, 128>}]} {
    %c0_i32 = arith.constant 0 : i32
    %0 = arith.cmpi eq, %arg1, %c0_i32 : i32
    %1 = arith.extui %0 : i1 to i32
    %c0_i32_0 = arith.constant 0 : i32
    %2 = arith.cmpi ne, %1, %c0_i32_0 : i32
    scf.if %2 {
      %cst_21 = arith.constant 0.000000e+00 : f32
      %33 = vector.broadcast %cst_21 : f32 to vector<2x8x128xf32>
      %c0_22 = arith.constant 0 : index
      %c0_23 = arith.constant 0 : index
      %c0_24 = arith.constant 0 : index
      %34 = vector.load %arg5[%c0_22, %c0_23, %c0_24] : memref<2x8x128xf32, #tpu.memory_space<vmem>>, vector<2x8x128xf32>
      tpu.vector_store %arg5[%c0_22, %c0_23, %c0_24], %33 {strides = array<i32>} : memref<2x8x128xf32, #tpu.memory_space<vmem>>, vector<2x8x128xf32>,
    } else {
    }
    %c0 = arith.constant 0 : index
    %c0_1 = arith.constant 0 : index
    %3 = vector.load %arg2[%c0, %c0_1] : memref<16x128xf32, #tpu.memory_space<vmem>>, vector<16x128xf32>
    %cst = arith.constant 5.000000e-01 : f32
    %4 = vector.broadcast %cst : f32 to vector<16x128xf32>
    %5 = arith.mulf %4, %3 : vector<16x128xf32>
    %6 = math.tanh %5 : vector<16x128xf32>
    %cst_2 = arith.constant 5.000000e-01 : f32
    %7 = vector.broadcast %cst_2 : f32 to vector<16x128xf32>
    %8 = arith.mulf %7, %6 : vector<16x128xf32>
    %cst_3 = arith.constant 5.000000e-01 : f32
    %9 = vector.broadcast %cst_3 : f32 to vector<16x128xf32>
    %10 = arith.addf %8, %9 : vector<16x128xf32>
    %c0_4 = arith.constant 0 : index
    %c0_5 = arith.constant 0 : index
    %11 = vector.load %arg3[%c0_4, %c0_5] : memref<16x128xf32, #tpu.memory_space<vmem>>, vector<16x128xf32>
    %c0_6 = arith.constant 0 : index
    %c0_7 = arith.constant 0 : index
    %c0_8 = arith.constant 0 : index
    %12 = vector.load %arg5[%c0_6, %c0_7, %c0_8] : memref<2x8x128xf32, #tpu.memory_space<vmem>>, vector<1x8x128xf32>
    %13 = vector.shape_cast %12 : vector<1x8x128xf32> to vector<8x128xf32>
    %14 = arith.mulf %10, %11 : vector<16x128xf32>
    %15 = vector.shape_cast %14 : vector<16x128xf32> to vector<2x8x128xf32>
    %cst_9 = arith.constant dense<0.000000e+00> : vector<8x128xf32>
    %16 = vector.multi_reduction <add>, %15, %cst_9 [0] : vector<2x8x128xf32> to vector<8x128xf32>
    %17 = arith.addf %13, %16 : vector<8x128xf32>
    %c0_10 = arith.constant 0 : index
    %c0_11 = arith.constant 0 : index
    %c0_12 = arith.constant 0 : index
    %18 = vector.load %arg5[%c0_10, %c0_11, %c0_12] : memref<2x8x128xf32, #tpu.memory_space<vmem>>, vector<1x8x128xf32>
    %19 = vector.shape_cast %18 : vector<1x8x128xf32> to vector<8x128xf32>
    %20 = vector.shape_cast %17 : vector<8x128xf32> to vector<1x8x128xf32>
    tpu.vector_store %arg5[%c0_10, %c0_11, %c0_12], %20 {strides = array<i32>} : memref<2x8x128xf32, #tpu.memory_space<vmem>>, vector<1x8x128xf32>,
    %c1 = arith.constant 1 : index
    %c0_13 = arith.constant 0 : index
    %c0_14 = arith.constant 0 : index
    %21 = vector.load %arg5[%c1, %c0_13, %c0_14] : memref<2x8x128xf32, #tpu.memory_space<vmem>>, vector<1x8x128xf32>
    %22 = vector.shape_cast %21 : vector<1x8x128xf32> to vector<8x128xf32>
    %23 = arith.addf %10, %11 : vector<16x128xf32>
    %24 = vector.shape_cast %23 : vector<16x128xf32> to vector<2x8x128xf32>
    %cst_15 = arith.constant dense<0.000000e+00> : vector<8x128xf32>
    %25 = vector.multi_reduction <add>, %24, %cst_15 [0] : vector<2x8x128xf32> to vector<8x128xf32>
    %26 = arith.addf %22, %25 : vector<8x128xf32>
    %c1_16 = arith.constant 1 : index
    %c0_17 = arith.constant 0 : index
    %c0_18 = arith.constant 0 : index
    %27 = vector.load %arg5[%c1_16, %c0_17, %c0_18] : memref<2x8x128xf32, #tpu.memory_space<vmem>>, vector<1x8x128xf32>
    %28 = vector.shape_cast %27 : vector<1x8x128xf32> to vector<8x128xf32>
    %29 = vector.shape_cast %26 : vector<8x128xf32> to vector<1x8x128xf32>
    tpu.vector_store %arg5[%c1_16, %c0_17, %c0_18], %29 {strides = array<i32>} : memref<2x8x128xf32, #tpu.memory_space<vmem>>, vector<1x8x128xf32>,
    %c0_i32_19 = arith.constant 0 : i32
    %30 = arith.cmpi eq, %arg1, %c0_i32_19 : i32
    %31 = arith.extui %30 : i1 to i32
    %c0_i32_20 = arith.constant 0 : i32
    %32 = arith.cmpi ne, %31, %c0_i32_20 : i32
    scf.if %32 {
      %c0_21 = arith.constant 0 : index
      %c0_22 = arith.constant 0 : index
      %c0_23 = arith.constant 0 : index
      %33 = vector.load %arg5[%c0_21, %c0_22, %c0_23] : memref<2x8x128xf32, #tpu.memory_space<vmem>>, vector<2x8x128xf32>
      %c0_24 = arith.constant 0 : index
      %c0_25 = arith.constant 0 : index
      %c0_26 = arith.constant 0 : index
      %c0_27 = arith.constant 0 : index
      %34 = vector.load %arg4[%c0_24, %c0_25, %c0_26, %c0_27] : memref<1x2x8x128xf32, #tpu.memory_space<vmem>>, vector<1x2x8x128xf32>
      %35 = vector.shape_cast %34 : vector<1x2x8x128xf32> to vector<2x8x128xf32>
      %36 = vector.shape_cast %33 : vector<2x8x128xf32> to vector<1x2x8x128xf32>
      tpu.vector_store %arg4[%c0_24, %c0_25, %c0_26, %c0_27], %36 {strides = array<i32>} : memref<1x2x8x128xf32, #tpu.memory_space<vmem>>, vector<1x2x8x128xf32>,
    } else {
    }
    return
  }
  func.func @transform_0(%arg0: i32, %arg1: i32) -> (i32, i32) {
    %c1_i32 = arith.constant 1 : i32
    %0 = arith.muli %arg0, %c1_i32 : i32
    %1 = arith.addi %0, %arg1 : i32
    %c0_i32 = arith.constant 0 : i32
    %c0_i32_0 = arith.constant 0 : i32
    return %1, %c0_i32 : i32, i32
  }
  func.func @transform_1(%arg0: i32, %arg1: i32) -> (i32, i32) {
    %c1_i32 = arith.constant 1 : i32
    %0 = arith.muli %arg0, %c1_i32 : i32
    %1 = arith.addi %0, %arg1 : i32
    %c0_i32 = arith.constant 0 : i32
    %c0_i32_0 = arith.constant 0 : i32
    return %1, %c0_i32 : i32, i32
  }
  func.func @transform_2(%arg0: i32, %arg1: i32) -> (i32, i32, i32, i32) {
    %c0_i32 = arith.constant 0 : i32
    %c0_i32_0 = arith.constant 0 : i32
    %c0_i32_1 = arith.constant 0 : i32
    %c0_i32_2 = arith.constant 0 : i32
    return %arg0, %c0_i32, %c0_i32_0, %c0_i32_1 : i32, i32, i32, i32
  }
}

</mosaic_0001>

<bundles_post_ra>
// kernel: tpu_custom_call.1
= control target key start
LH: loop header
LB: loop body
LE: loop exit
PB: predicated region body
PF: predicated region fallthrough
CT: control target
= control target key end

     0   :  { %7 = vsyncpa [#allocation4], 0  ;;  %s254_s0 = inlined_call_operand.hbm [shape: f32[16,128], index: 0, kind: input, shape index: {}]   ;;  %s255_s1 = inlined_call_operand.hbm [shape: f32[16,128], index: 1, kind: input, shape index: {}]   ;;  %s256_s2 = inlined_call_operand.hbm [shape: f32[1,2,8,128], index: 2, kind: output, shape index: {}]  }
   0x1   :  { %8 = vsyncpa [#allocation7], 0 }
   0x2   :  { %9 = vsyncpa [#allocation5], 0  ;;  %s189_s9 = smov [#allocation3]   ;;  %s117_s13 = scalar_lea.hbm %s254_s0, 256 }
   0x3   :  { %s19_s10 = sshll.u32 %s189_s9, 4  ;;  %p118_p0 = scmp.ne.s32.totalorder %s254_s0, %s117_s13  ;;  %s20_s10 = int_to_ptr.vmem [resolvable:$true] %s19_s10 }
   0x4   :  { %p121_p1 = scmp.lt.u32.totalorder %s117_s13, %s254_s0 }
   0x6   :  { %p123_p2 = pnand %p121_p1, %p118_p0 }
   0x8   :  { %126 = shalt.err (!%p123_p2)
}
   0x9   :  { %s127_s18 = scalar_lea.vmem %s20_s10, 256  ;;  %p132_p4 = scmp.lt.s32.totalorder %s20_s10, %s20_s10 }
   0xa   :  { %p128_p3 = scmp.ne.s32.totalorder %s20_s10, %s127_s18  ;;  %p133_p5 = scmp.lt.s32.totalorder %s127_s18, %s127_s18 }
   0xc   :  { %p134_p6 = por %p133_p5, %p132_p4 }
   0xe   :  { %p135_p7 = pnand %p134_p6, %p128_p3 }
  0x10   :  { %138 = shalt.err (!%p135_p7)
}
  0x11   :  { %s190_s19 = smov 128   ;;  %s191_s20 = smov 8  }
  0x12   :  { %25 = dma.hbm_to_vmem [thread:$0]  %s254_s0, 256, %s20_s10, [#allocation4], %s190_s19, %s190_s19, %s191_s20  }
  0x13   :  { %s192_s23 = smov [#allocation6]   ;;  %s139_s27 = scalar_lea.hbm %s255_s1, 256 }
  0x14   :  { %s35_s24 = sshll.u32 %s192_s23, 4  ;;  %p140_p8 = scmp.ne.s32.totalorder %s255_s1, %s139_s27  ;;  %s36_s24 = int_to_ptr.vmem [resolvable:$true] %s35_s24 }
  0x15   :  { %p143_p9 = scmp.lt.u32.totalorder %s139_s27, %s255_s1 }
  0x17   :  { %p145_p10 = pnand %p143_p9, %p140_p8 }
  0x19   :  { %148 = shalt.err (!%p145_p10)
}
  0x1a   :  { %s149_s4 = scalar_lea.vmem %s36_s24, 256  ;;  %p154_p12 = scmp.lt.s32.totalorder %s36_s24, %s36_s24 }
  0x1b   :  { %p150_p11 = scmp.ne.s32.totalorder %s36_s24, %s149_s4  ;;  %p155_p13 = scmp.lt.s32.totalorder %s149_s4, %s149_s4 }
  0x1d   :  { %p156_p0 = por %p155_p13, %p154_p12 }
  0x1f   :  { %p157_p1 = pnand %p156_p0, %p150_p11 }
  0x21   :  { %160 = shalt.err (!%p157_p1)
}
  0x22   :  { %41 = dma.hbm_to_vmem [thread:$0]  %s255_s1, 256, %s36_s24, [#allocation7], %s190_s19, %s190_s19, %s191_s20  }
  0x23   :  { %183 = dma.done.wait [#allocation4], 256  }
  0x24   :  { %184 = vsyncadd [#allocation4], 4294967040 }
  0x25   :  { %185 = dma.done.wait [#allocation7], 256  }
  0x26   :  { %186 = vsyncadd [#allocation7], 4294967040  ;;  %v58_v0 = vld [vmem:[#allocation3] sm:$0xff]  ;;  %v59_v1 = vld [vmem:[#allocation3 + $0x8] sm:$0xff]  ;;  %s193_s1 = smov [#allocation8]  }
  0x27   :  { %v60_v2 = vmul.f32 0.5, %v58_v0  ;;  %v61_v3 = vmul.f32 0.5, %v59_v1  ;;  %v68_v8 = vld [vmem:[#allocation6] sm:$0xff]  ;;  %v69_v10 = vld [vmem:[#allocation6 + $0x8] sm:$0xff]  ;;  %s95_s6 = sshll.u32 %s193_s1, 4  ;;  %s96_s6 = int_to_ptr.vmem [resolvable:$true] %s95_s6 }
  0x28   :  { %s161_s7 = scalar_lea.vmem %s96_s6, 256  ;;  %p166_p3 = scmp.lt.s32.totalorder %s96_s6, %s96_s6 }
  0x29   :  { %113 = vtanh.f32 %v60_v2  ;;  %p162_p2 = scmp.ne.s32.totalorder %s96_s6, %s161_s7  ;;  %p167_p4 = scmp.lt.s32.totalorder %s161_s7, %s161_s7 }
  0x2a   :  { %115 = vtanh.f32 %v61_v3 }
  0x2b   :  { %p168_p5 = por %p167_p4, %p166_p3 }
  0x2d   :  { %p169_p6 = pnand %p168_p5, %p162_p2 }
  0x33   :  { %v114_v4 = vpop.eup %113 }
  0x34   :  { %v116_v5 = vpop.eup %115  ;;  %v64_v6 = vmul.f32 0.5, %v114_v4 }
  0x35   :  { %v65_v7 = vmul.f32 0.5, %v116_v5 }
  0x36   :  { %v66_v9 = vadd.f32 0.5, %v64_v6 }
  0x37   :  { %v67_v11 = vadd.f32 0.5, %v65_v7 }
  0x38   :  { %v71_v12 = vmul.f32 %v68_v8, %v66_v9  ;;  %v78_v13 = vadd.f32 %v68_v8, %v66_v9 }
  0x39   :  { %v72_v14 = vmul.f32 %v69_v10, %v67_v11  ;;  %v79_v15 = vadd.f32 %v69_v10, %v67_v11 }
  0x3b   :  { %v73_v16 = vadd.f32 %v72_v14, %v71_v12  ;;  %v80_v17 = vadd.f32 %v79_v15, %v78_v13 }
  0x3d   :  { %88 = vst [vmem:[#allocation8] sm:$0xff] %v73_v16  ;;  %89 = vst [vmem:[#allocation8 + $0x8] sm:$0xff] %v80_v17 }
  0x3e   :  { %172 = shalt.err (!%p169_p6)
}
  0x3f   :  { %s173_s10 = scalar_lea.hbm %s256_s2, 256 }
  0x40   :  { %p174_p7 = scmp.ne.s32.totalorder %s256_s2, %s173_s10  ;;  %p177_p8 = scmp.lt.u32.totalorder %s173_s10, %s256_s2 }
  0x42   :  { %p179_p9 = pnand %p177_p8, %p174_p7 }
  0x44   :  { %182 = shalt.err (!%p179_p9)
}
  0x45   :  { %101 = dma.vmem_to_hbm [thread:$0]  %s96_s6, 256, %s256_s2, [#allocation5], %s190_s19, %s190_s19, %s191_s20  }
  0x46   :  { %187 = dma.done.wait [#allocation5], 256  }
  0x47   :  { %188 = vsyncadd [#allocation5], 4294967040 }
  0x48   :  { %105 = vsyncpa [#allocation4], 1 }
  0x49   :  { %106 = vsyncpa [#allocation7], 1 }
  0x4a   :  { %107 = vsyncpa [#allocation5], 1 }

</bundles_post_ra>
